<compile_context>
chip_gen: v7x
topology: tpu7x:2x2x1
jax: 0.10.0
libtpu: 0.0.40
codegen_flags: <defaults>
</compile_context>

<pallas_src>
import functools

import jax
import jax.numpy as jnp
from jax.experimental import pallas as pl
from jax.experimental.pallas import tpu as pltpu


def _blur_kernel(col_ref, x_ref, o_ref, *, H, W, compute_dtype):
    """col_ref: (1, H*W) int32 column index (j % W) of the flattened planes.
    x_ref / o_ref: (bc_tile, H*W) blocks of the flattened (B*C, H*W) planes."""
    HW = H * W

    # Reflect-border masks, built once per grid step at (1, H*W) and broadcast
    # inside the selects below.
    col = col_ref[...]
    first_col = col == 0
    last_col = col == W - 1
    pos = jax.lax.broadcasted_iota(jnp.int32, (1, HW), 1)
    first_row = pos < W
    last_row = pos >= HW - W

    x = x_ref[...].astype(compute_dtype)            # (bc_tile, H*W)

    # Horizontal pass, un-normalized: x[j-1] + 2*x[j] + x[j+1] with reflect at
    # the row edges. left/right are cyclic lane rotations; the reflect fix-ups
    # reuse them (2*x[j+1] at the first column, 2*x[j-1] at the last column).
    left = pltpu.roll(x, shift=1, axis=1)           # holds x[., j-1]
    right = pltpu.roll(x, shift=HW - 1, axis=1)     # holds x[., j+1]
    t = (x + x
         + jnp.where(first_col, right, left)
         + jnp.where(last_col, left, right))

    # Vertical pass, un-normalized: t[i-1] + 2*t[i] + t[i+1] with reflect; row
    # offsets are lane rotations by +-W in the flattened layout.
    up = pltpu.roll(t, shift=W, axis=1)             # holds t[i-1, .]
    down = pltpu.roll(t, shift=HW - W, axis=1)      # holds t[i+1, .]
    y = (t + t
         + jnp.where(first_row, down, up)
         + jnp.where(last_row, up, down))

    # Single folded normalization: the 3x3 kernel sums to 16.
    o_ref[...] = (y * (1.0 / 16.0)).astype(o_ref.dtype)


def _round_up(x, m):
    return ((x + m - 1) // m) * m


def _vmem_params():
    """(accounting budget, vmem_limit_bytes), scaled to the chip generation."""
    try:
        phys = pltpu.get_tpu_info().vmem_capacity_bytes
    except Exception:
        phys = 64 * 1024 * 1024          # assume the smallest (v7x per-TC VMEM)
    # 48 MiB on v7x (64 MiB physical), 64 MiB on v5e/v6e (128 MiB physical).
    vmem_limit = min((phys * 3) // 4, 64 * 1024 * 1024)
    budget = max(vmem_limit // 3, 8 * 1024 * 1024)   # ~3x margin for the estimate
    return budget, vmem_limit


def _pick_bc_tile(BC, HW, in_dsize, compute_dsize, budget):
    """How many whole planes (rows of the (B*C, H*W) view) per grid step."""
    hw_pad = _round_up(HW, 128)          # lane padding of the VMEM tiles
    # Double-buffered in+out blocks (input dtype) plus ~6 live compute-dtype
    # temporaries per plane inside the kernel.
    per_plane = hw_pad * (4 * in_dsize + 6 * compute_dsize)
    mask_overhead = 8 * hw_pad           # (1, H*W) iota / column indices / masks
    vmem_cap = max(1, (budget - mask_overhead) // per_plane)

    # Keep each block's input DMA at >= ~0.5 MiB ...
    min_planes = max(1, (512 * 1024) // max(1, HW * in_dsize))
    # ... but aim for >= 8 grid steps so prologue/epilogue DMAs get hidden
    # (>= 4 steps per TensorCore on v7x).
    step_tile = pl.cdiv(BC, 8)

    tile = min(max(min_planes, step_tile), vmem_cap, BC)
    if tile >= BC:
        return BC
    # (8,128) rule for the (tile, H*W) block: sublane dim a multiple of 8
    # (the full-B*C case is handled above).
    up8 = _round_up(tile, 8)
    if up8 <= vmem_cap:
        return min(up8, BC)
    down8 = (tile // 8) * 8
    return down8 if down8 >= 8 else tile


def blur(x, bc_tile=None):
    """x: (B, C, H, W) -> (B, C, H, W); 3x3 [1,2,1]x[1,2,1]/16 blur, reflect pad."""
    B, C, H, W = x.shape
    assert H >= 2 and W >= 2, "reflect padding requires H >= 2 and W >= 2"
    BC, HW = B * C, H * W

    # Flatten to (B*C, H*W): free for contiguous NCHW, makes the lane dim H*W.
    x2 = x.reshape(BC, HW)
    col_ids = (jnp.arange(HW, dtype=jnp.int32) % W).reshape(1, HW)

    in_dsize = jnp.dtype(x.dtype).itemsize
    compute_dtype = jnp.bfloat16 if x.dtype == jnp.bfloat16 else jnp.float32
    compute_dsize = jnp.dtype(compute_dtype).itemsize

    budget, vmem_limit = _vmem_params()
    if bc_tile is None:
        bc_tile = _pick_bc_tile(BC, HW, in_dsize, compute_dsize, budget)
    bc_tile = min(bc_tile, BC)
    grid = (pl.cdiv(BC, bc_tile),)

    out = pl.pallas_call(
        functools.partial(_blur_kernel, H=H, W=W, compute_dtype=compute_dtype),
        out_shape=jax.ShapeDtypeStruct((BC, HW), x.dtype),
        grid=grid,
        in_specs=[
            pl.BlockSpec((1, HW), lambda i: (0, 0)),        # column indices
            pl.BlockSpec((bc_tile, HW), lambda i: (i, 0)),  # input planes
        ],
        out_specs=pl.BlockSpec((bc_tile, HW), lambda i: (i, 0)),
        compiler_params=pltpu.CompilerParams(
            dimension_semantics=("parallel",),
            vmem_limit_bytes=vmem_limit,
        ),
        cost_estimate=pl.CostEstimate(
            flops=11 * BC * HW,
            transcendentals=0,
            bytes_accessed=2 * BC * HW * in_dsize + 4 * HW,
        ),
    )(col_ids, x2)
    return out.reshape(B, C, H, W)


def _reference_blur(x):
    # Pure-JAX reference (9-tap, explicit reflect pad) for the sanity check.
    k = jnp.array([1.0, 2.0, 1.0], jnp.float32)
    k = (k[:, None] * k[None, :]) / 16.0
    xp = jnp.pad(x.astype(jnp.float32), ((0, 0), (0, 0), (1, 1), (1, 1)),
                 mode="reflect")
    B, C, H, W = x.shape
    acc = jnp.zeros((B, C, H, W), jnp.float32)
    for di in range(3):
        for dj in range(3):
            acc = acc + k[di, dj] * xp[:, :, di:di + H, dj:dj + W]
    return acc.astype(x.dtype)


if __name__ == "__main__":
    key = jax.random.PRNGKey(0)
    x = jax.random.normal(key, (2, 4, 16, 16), dtype=jnp.float32)

    y = blur(x)
    jax.block_until_ready(y)

    y_ref = _reference_blur(x)
    assert y.shape == x.shape and y.dtype == x.dtype
    assert jnp.allclose(y, y_ref, atol=1e-5, rtol=1e-5)

    # Exercise the masked-tail path (B*C not a multiple of the block size).
    x2 = jax.random.normal(jax.random.PRNGKey(0), (3, 5, 16, 16), dtype=jnp.float32)
    y2 = blur(x2, bc_tile=8)          # grid = cdiv(15, 8) = 2, partial last block
    jax.block_until_ready(y2)
    assert jnp.allclose(y2, _reference_blur(x2), atol=1e-5, rtol=1e-5)

    print("KERNEL_OK")
</pallas_src>

<mosaic_0001>
module attributes {stable_mosaic.version = 11 : i64} {
  func.func @_blur_kernel(%arg0: i32, %arg1: memref<1x256xi32, #tpu.memory_space<vmem>>, %arg2: memref<8x256xf32, #tpu.memory_space<vmem>>, %arg3: memref<8x256xf32, #tpu.memory_space<vmem>>) attributes {dimension_semantics = [#tpu.dimension_semantics<parallel>], iteration_bounds = array<i64: 1>, scalar_prefetch = 0 : i64, scratch_operands = 0 : i64, tpu.core_type = #tpu.core_type<tc>, window_params = [{pipeline_mode = #tpu.pipeline_mode<synchronous>, transform_indices = @transform_0, window_bounds = array<i64: 1, 256>}, {transform_indices = @transform_1, window_bounds = array<i64: 8, 256>}, {transform_indices = @transform_2, window_bounds = array<i64: 8, 256>}]} {
    %c0 = arith.constant 0 : index
    %c0_0 = arith.constant 0 : index
    %0 = vector.load %arg1[%c0, %c0_0] : memref<1x256xi32, #tpu.memory_space<vmem>>, vector<1x256xi32>
    %c0_i32 = arith.constant 0 : i32
    %1 = vector.broadcast %c0_i32 : i32 to vector<1x256xi32>
    %2 = arith.cmpi eq, %0, %1 : vector<1x256xi32>
    %c15_i32 = arith.constant 15 : i32
    %3 = vector.broadcast %c15_i32 : i32 to vector<1x256xi32>
    %4 = arith.cmpi eq, %0, %3 : vector<1x256xi32>
    %5 = tpu.iota {dimensions = array<i32: 1>} : vector<1x256xi32>
    %c16_i32 = arith.constant 16 : i32
    %6 = vector.broadcast %c16_i32 : i32 to vector<1x256xi32>
    %7 = arith.cmpi slt, %5, %6 : vector<1x256xi32>
    %c240_i32 = arith.constant 240 : i32
    %8 = vector.broadcast %c240_i32 : i32 to vector<1x256xi32>
    %9 = arith.cmpi sge, %5, %8 : vector<1x256xi32>
    %c0_1 = arith.constant 0 : index
    %c0_2 = arith.constant 0 : index
    %10 = vector.load %arg2[%c0_1, %c0_2] : memref<8x256xf32, #tpu.memory_space<vmem>>, vector<8x256xf32>
    %c1_i32 = arith.constant 1 : i32
    %11 = tpu.dynamic_rotate %10 by %c1_i32 dim 1 : vector<8x256xf32>, i32 -> vector<8x256xf32>
    %c255_i32 = arith.constant 255 : i32
    %12 = tpu.dynamic_rotate %10 by %c255_i32 dim 1 : vector<8x256xf32>, i32 -> vector<8x256xf32>
    %13 = arith.addf %10, %10 : vector<8x256xf32>
    %14 = vector.shape_cast %2 : vector<1x256xi1> to vector<1x256xi1>
    %15 = vector.broadcast %14 : vector<1x256xi1> to vector<8x256xi1>
    %16 = arith.select %15, %12, %11 : vector<8x256xi1>, vector<8x256xf32>
    %17 = arith.addf %13, %16 : vector<8x256xf32>
    %18 = vector.shape_cast %4 : vector<1x256xi1> to vector<1x256xi1>
    %19 = vector.broadcast %18 : vector<1x256xi1> to vector<8x256xi1>
    %20 = arith.select %19, %11, %12 : vector<8x256xi1>, vector<8x256xf32>
    %21 = arith.addf %17, %20 : vector<8x256xf32>
    %c16_i32_3 = arith.constant 16 : i32
    %22 = tpu.dynamic_rotate %21 by %c16_i32_3 dim 1 : vector<8x256xf32>, i32 -> vector<8x256xf32>
    %c240_i32_4 = arith.constant 240 : i32
    %23 = tpu.dynamic_rotate %21 by %c240_i32_4 dim 1 : vector<8x256xf32>, i32 -> vector<8x256xf32>
    %24 = arith.addf %21, %21 : vector<8x256xf32>
    %25 = vector.shape_cast %7 : vector<1x256xi1> to vector<1x256xi1>
    %26 = vector.broadcast %25 : vector<1x256xi1> to vector<8x256xi1>
    %27 = arith.select %26, %23, %22 : vector<8x256xi1>, vector<8x256xf32>
    %28 = arith.addf %24, %27 : vector<8x256xf32>
    %29 = vector.shape_cast %9 : vector<1x256xi1> to vector<1x256xi1>
    %30 = vector.broadcast %29 : vector<1x256xi1> to vector<8x256xi1>
    %31 = arith.select %30, %22, %23 : vector<8x256xi1>, vector<8x256xf32>
    %32 = arith.addf %28, %31 : vector<8x256xf32>
    %cst = arith.constant 6.250000e-02 : f32
    %33 = vector.broadcast %cst : f32 to vector<8x256xf32>
    %34 = arith.mulf %32, %33 : vector<8x256xf32>
    %c0_5 = arith.constant 0 : index
    %c0_6 = arith.constant 0 : index
    %35 = vector.load %arg3[%c0_5, %c0_6] : memref<8x256xf32, #tpu.memory_space<vmem>>, vector<8x256xf32>
    tpu.vector_store %arg3[%c0_5, %c0_6], %34 {strides = array<i32>} : memref<8x256xf32, #tpu.memory_space<vmem>>, vector<8x256xf32>,
    return
  }
  func.func @transform_0(%arg0: i32) -> (i32, i32) {
    %c0_i32 = arith.constant 0 : i32
    %c0_i32_0 = arith.constant 0 : i32
    %c0_i32_1 = arith.constant 0 : i32
    return %c0_i32, %c0_i32_0 : i32, i32
  }
  func.func @transform_1(%arg0: i32) -> (i32, i32) {
    %c0_i32 = arith.constant 0 : i32
    %c0_i32_0 = arith.constant 0 : i32
    return %arg0, %c0_i32 : i32, i32
  }
  func.func @transform_2(%arg0: i32) -> (i32, i32) {
    %c0_i32 = arith.constant 0 : i32
    %c0_i32_0 = arith.constant 0 : i32
    return %arg0, %c0_i32 : i32, i32
  }
}

</mosaic_0001>

<bundles_post_ra>
// kernel: tpu_custom_call.1
= control target key start
LH: loop header
LB: loop body
LE: loop exit
PB: predicated region body
PF: predicated region fallthrough
CT: control target
= control target key end

     0   :  { %7 = vsyncpa [#allocation3], 0  ;;  %s284_s0 = inlined_call_operand.hbm [shape: s32[1,256], index: 0, kind: input, shape index: {}]   ;;  %s285_s1 = inlined_call_operand.hbm [shape: f32[8,256], index: 1, kind: input, shape index: {}]   ;;  %s286_s2 = inlined_call_operand.hbm [shape: f32[8,256], index: 2, kind: output, shape index: {}]  }
   0x1   :  { %8 = vsyncpa [#allocation6], 0 }
   0x2   :  { %9 = vsyncpa [#allocation4], 0  ;;  %s225_s9 = smov [#allocation2]   ;;  %s226_s11 = smov [#allocation5]  }
   0x3   :  { %s16_s10 = sshll.u32 %s225_s9, 4  ;;  %s26_s12 = sshll.u32 %s226_s11, 4  ;;  %s17_s10 = int_to_ptr.vmem [resolvable:$true] %s16_s10  ;;  %s27_s12 = int_to_ptr.vmem [resolvable:$true] %s26_s12 }
   0x4   :  { %s153_s15 = scalar_lea.hbm %s284_s0, 32 }
   0x5   :  { %p154_p0 = scmp.ne.s32.totalorder %s284_s0, %s153_s15  ;;  %p157_p1 = scmp.lt.u32.totalorder %s153_s15, %s284_s0 }
   0x7   :  { %p159_p2 = pnand %p157_p1, %p154_p0 }
   0x9   :  { %162 = shalt.err (!%p159_p2)
}
   0xa   :  { %s163_s20 = scalar_lea.vmem %s17_s10, 32  ;;  %p168_p4 = scmp.lt.s32.totalorder %s17_s10, %s17_s10 }
   0xb   :  { %p164_p3 = scmp.ne.s32.totalorder %s17_s10, %s163_s20  ;;  %p169_p5 = scmp.lt.s32.totalorder %s163_s20, %s163_s20 }
   0xd   :  { %p170_p6 = por %p169_p5, %p168_p4 }
   0xf   :  { %p171_p7 = pnand %p170_p6, %p164_p3 }
  0x11   :  { %174 = shalt.err (!%p171_p7)
}
  0x12   :  { %19 = dma.hbm_to_vmem [thread:$0]  %s284_s0, 32, %s17_s10, [#allocation3]  }
  0x13   :  { %s175_s25 = scalar_lea.hbm %s285_s1, 256 }
  0x14   :  { %p176_p8 = scmp.ne.s32.totalorder %s285_s1, %s175_s25  ;;  %p179_p9 = scmp.lt.u32.totalorder %s175_s25, %s285_s1 }
  0x16   :  { %p181_p10 = pnand %p179_p9, %p176_p8 }
  0x18   :  { %184 = shalt.err (!%p181_p10)
}
  0x19   :  { %s185_s30 = scalar_lea.vmem %s27_s12, 256  ;;  %p190_p12 = scmp.lt.s32.totalorder %s27_s12, %s27_s12 }
  0x1a   :  { %p186_p11 = scmp.ne.s32.totalorder %s27_s12, %s185_s30  ;;  %p191_p13 = scmp.lt.s32.totalorder %s185_s30, %s185_s30 }
  0x1c   :  { %p192_p0 = por %p191_p13, %p190_p12 }
  0x1e   :  { %p193_p1 = pnand %p192_p0, %p186_p11 }
  0x20   :  { %196 = shalt.err (!%p193_p1)
}
  0x21   :  { %29 = dma.hbm_to_vmem [thread:$0]  %s285_s1, 256, %s27_s12, [#allocation6]  }
  0x22   :  { %219 = dma.done.wait [#allocation3], 32  }
  0x23   :  { %220 = vsyncadd [#allocation3], 4294967264 }
  0x24   :  { %221 = dma.done.wait [#allocation6], 256  }
  0x25   :  { %222 = vsyncadd [#allocation6], 4294967040  ;;  %v46_v0 = vld [vmem:[#allocation5] sm:$0xff]  ;;  %s227_s4 = smov 127   ;;  %s228_s5 = smov 1   ;;  %v47_v1 = vld [vmem:[#allocation5 + $0x8] sm:$0xff]  ;;  %v39_v2 = vlaneseq }
  0x26   :  { %55 = vrot.lane.b32.xlu1 %v46_v0, %s227_s4  ;;  %48 = vrot.lane.b32.xlu0 %v46_v0, %s228_s5  ;;  %v36_v3 = vld [vmem:[#allocation2] sm:$0x3]  ;;  %v229_v7 = vmov 0   ;;  %v62_v17 = vadd.f32 %v46_v0, %v46_v0  ;;  %v63_v18 = vadd.f32 %v47_v1, %v47_v1  ;;  %s230_s1 = smov 16   ;;  %s231_s6 = smov 112  }
  0x27   :  { %v66_v4 = vshrl.u32 %v39_v2, 7  ;;  %vm37_vm0 = vcmp.eq.s32.totalorder %v36_v3, 0  ;;  %vm38_vm1 = vcmp.eq.s32.totalorder %v36_v3, 15  ;;  %v40_v10 = vand.u32 127, %v39_v2  ;;  %s232_s7 = smov [#allocation7]  }
  0x28   :  { %v64_v8 = vsel %vm37_vm0, 1, %v229_v7  ;;  %v79_v9 = vsel %vm38_vm1, 1, %v229_v7  ;;  %s135_s8 = sshll.u32 %s232_s7, 4  ;;  %s136_s8 = int_to_ptr.vmem [resolvable:$true] %s135_s8 }
  0x29   :  { %v67_v5 = vsub.s32 0, %v66_v4  ;;  %v71_v6 = vsub.s32 1, %v66_v4  ;;  %vm59_vm2 = vcmp.lt.s32.totalorder %v40_v10, 127  ;;  %vm52_vm3 = vcmp.lt.s32.totalorder %v40_v10, 1  ;;  %s197_s9 = scalar_lea.vmem %s136_s8, 256  ;;  %p202_p3 = scmp.lt.s32.totalorder %s136_s8, %s136_s8 }
  0x2a   :  { %57 = vrot.lane.b32.xlu1 %v47_v1, %s227_s4  ;;  %50 = vrot.lane.b32.xlu0 %v47_v1, %s228_s5  ;;  %vm42_vm8 = vcmp.lt.s32.totalorder %v40_v10, 16  ;;  %v41_v33 = vadd.s32 128, %v40_v10  ;;  %vm104_vm9 = vcmp.lt.s32.totalorder %v40_v10, 112  ;;  %p198_p2 = scmp.ne.s32.totalorder %s136_s8, %s197_s9  ;;  %p203_p4 = scmp.lt.s32.totalorder %s197_s9, %s197_s9 }
  0x2b   :  { %v68_v11 = vrot.slane %v64_v8, %v67_v5  ;;  %v72_v12 = vrot.slane %v64_v8, %v71_v6  ;;  %v83_v15 = vrot.slane %v79_v9, %v67_v5  ;;  %v87_v16 = vrot.slane %v79_v9, %v71_v6 }
  0x2c   :  { %vm45_vm10 = vcmp.ge.s32.totalorder %v41_v33, 240  ;;  %p204_p5 = por %p203_p4, %p202_p3 }
  0x2d   :  { %vm73_vm4 = vcmp.eq.s32.totalorder %v68_v11, 1  ;;  %vm74_vm5 = vcmp.eq.s32.totalorder %v72_v12, 1  ;;  %vm88_vm6 = vcmp.eq.s32.totalorder %v83_v15, 1  ;;  %vm89_vm7 = vcmp.eq.s32.totalorder %v87_v16, 1 }
  0x2e   :  { %p205_p6 = pnand %p204_p5, %p198_p2 }
  0x98   :  { %v56_v13 = vpop.permute.xlu1 %55  ;;  %v49_v14 = vpop.permute.xlu0 %48 }
  0x9c   :  { %v58_v19 = vpop.permute.xlu1 %57  ;;  %v51_v20 = vpop.permute.xlu0 %50 }
  0x9d   :  { %v60_v21 = vsel %vm59_vm2, %v56_v13, %v58_v19  ;;  %v61_v22 = vsel %vm59_vm2, %v58_v19, %v56_v13  ;;  %v53_v23 = vsel %vm52_vm3, %v49_v14, %v51_v20  ;;  %v54_v24 = vsel %vm52_vm3, %v51_v20, %v49_v14 }
  0x9e   :  { %v75_v25 = vsel %vm73_vm4, %v60_v21, %v54_v24  ;;  %v76_v26 = vsel %vm74_vm5, %v61_v22, %v53_v23  ;;  %v90_v29 = vsel %vm88_vm6, %v54_v24, %v60_v21  ;;  %v91_v30 = vsel %vm89_vm7, %v53_v23, %v61_v22 }
  0x9f   :  { %v77_v27 = vadd.f32 %v75_v25, %v62_v17  ;;  %v78_v28 = vadd.f32 %v76_v26, %v63_v18 }
  0xa1   :  { %v93_v31 = vadd.f32 %v91_v30, %v78_v28  ;;  %v92_v32 = vadd.f32 %v90_v29, %v77_v27 }
  0xa3   :  { %96 = vrot.lane.b32.xlu1 %v93_v31, %s230_s1  ;;  %94 = vrot.lane.b32.xlu0 %v92_v32, %s230_s1  ;;  %v108_v37 = vadd.f32 %v93_v31, %v93_v31  ;;  %v107_v40 = vadd.f32 %v92_v32, %v92_v32 }
  0xa7   :  { %102 = vrot.lane.b32.xlu1 %v93_v31, %s231_s6  ;;  %100 = vrot.lane.b32.xlu0 %v92_v32, %s231_s6 }
 0x115   :  { %v97_v34 = vpop.permute.xlu1 %96  ;;  %v95_v35 = vpop.permute.xlu0 %94 }
 0x116   :  { %v98_v36 = vsel %vm42_vm8, %v95_v35, %v97_v34  ;;  %v99_v41 = vsel %vm42_vm8, %v97_v34, %v95_v35 }
 0x117   :  { %v116_v42 = vadd.f32 %v108_v37, %v98_v36 }
 0x119   :  { %v103_v38 = vpop.permute.xlu1 %102  ;;  %v101_v39 = vpop.permute.xlu0 %100 }
 0x11a   :  { %v105_v43 = vsel %vm104_vm9, %v101_v39, %v103_v38  ;;  %v106_v44 = vsel %vm104_vm9, %v103_v38, %v101_v39 }
 0x11b   :  { %v113_v45 = vsel %vm42_vm8, %v105_v43, %v99_v41  ;;  %v122_v46 = vsel %vm45_vm10, %v98_v36, %v106_v44 }
 0x11c   :  { %v115_v47 = vadd.f32 %v113_v45, %v107_v40  ;;  %v124_v48 = vadd.f32 %v122_v46, %v116_v42 }
 0x11e   :  { %v123_v49 = vadd.f32 %v115_v47, %v105_v43  ;;  %v126_v50 = vmul.f32 0.0625, %v124_v48 }
 0x120   :  { %v125_v51 = vmul.f32 0.0625, %v123_v49  ;;  %128 = vst [vmem:[#allocation7 + $0x8] sm:$0xff] %v126_v50 }
 0x122   :  { %127 = vst [vmem:[#allocation7] sm:$0xff] %v125_v51 }
 0x123   :  { %208 = shalt.err (!%p205_p6)
}
 0x124   :  { %s209_s12 = scalar_lea.hbm %s286_s2, 256 }
 0x125   :  { %p210_p7 = scmp.ne.s32.totalorder %s286_s2, %s209_s12  ;;  %p213_p8 = scmp.lt.u32.totalorder %s209_s12, %s286_s2 }
 0x127   :  { %p215_p9 = pnand %p213_p8, %p210_p7 }
 0x129   :  { %218 = shalt.err (!%p215_p9)
}
 0x12a   :  { %138 = dma.vmem_to_hbm [thread:$0]  %s136_s8, 256, %s286_s2, [#allocation4]  }
 0x12b   :  { %223 = dma.done.wait [#allocation4], 256  }
 0x12c   :  { %224 = vsyncadd [#allocation4], 4294967040 }
 0x12d   :  { %142 = vsyncpa [#allocation3], 1 }
 0x12e   :  { %143 = vsyncpa [#allocation6], 1 }
 0x12f   :  { %144 = vsyncpa [#allocation4], 1 }

</bundles_post_ra>
